<compile_context>
chip_gen: v7x
topology: tpu7x:2x2x1
jax: 0.10.0
libtpu: 0.0.40
codegen_flags: <defaults>
</compile_context>

<pallas_src>
from typing import NamedTuple

import jax
import jax.numpy as jnp
from jax.experimental import pallas as pl
from jax.experimental.pallas import tpu as pltpu

ORTHOGONAL_INIT_PI_GAIN = 0.01  # ORTHOGONAL_INIT_VALUES['pi']
_SUBLANE = 16                   # bf16 sublane packing (also a multiple of the f32 8)


def beta_head_kernel(x_ref, w_ref, b_ref, o_ref):
    """(packed) linear + softplus + 1 for one batch tile."""
    # MXU matmul with f32 accumulation.
    z = jnp.dot(x_ref[...], w_ref[...], preferred_element_type=jnp.float32)
    z = z + b_ref[...]  # (1, N) bias broadcasts over tile rows.
    # Numerically stable softplus in f32: max/abs on the VPU, exp/log1p on the EUP.
    sp = jnp.maximum(z, 0.0) + jnp.log1p(jnp.exp(-jnp.abs(z)))
    o_ref[...] = (sp + 1.0).astype(o_ref.dtype)


def _ceil_to(a, m):
    return -(-a // m) * m


def _block_diagonal(w, pack):
    """(in_size, C) -> (pack*in_size, pack*C) block-diagonal replication of w."""
    in_size, c = w.shape
    eye = jnp.eye(pack, dtype=w.dtype)
    return jnp.einsum("pq,kc->pkqc", eye, w).reshape(pack * in_size, pack * c)


class BetaHeadPacked(NamedTuple):
    w_packed: jax.Array  # (pack*in_size, pack*two_n), compute dtype
    b_packed: jax.Array  # (1, pack*two_n), f32
    pack: int
    in_size: int
    n_act: int
    num_policies: int


def pack_beta_head_params(w, b, n_act, num_policies=1, *, use_bf16_inputs=True,
                          max_packed_k=2048):
    """Build the VMEM-resident packed weight / bias ONCE (call at param-init time).

    w: [in_size, 2*n_act*num_policies] (pre-transposed Linear weight); b: [1, same].
    Lane-packing folds `pack = 128 // (2*n*num_policies)` batch rows into one lane-dense
    128-wide output row via a block-diagonal weight, so the kernel's stores/softplus run
    on full (·,128) tiles instead of 16-lane masked ones.
    """
    in_size, two_n = w.shape
    assert two_n == 2 * n_act * num_policies
    pack = 128 // two_n if (two_n <= 128 and 128 % two_n == 0) else 1
    # Gate: don't let the block-diagonal trick inflate the weight / K-dim indefinitely.
    while pack > 1 and pack * in_size > max_packed_k:
        pack //= 2
    compute_dtype = jnp.bfloat16 if use_bf16_inputs else jnp.float32
    w_packed = _block_diagonal(w, pack).astype(compute_dtype)
    b_packed = jnp.tile(b.reshape(1, two_n), (1, pack)).astype(jnp.float32)
    return BetaHeadPacked(w_packed, b_packed, pack, in_size, n_act, num_policies)


def beta_head_forward(x, params: BetaHeadPacked, *, block_rows=512,
                      out_dtype=jnp.float32, core_parallel=False):
    """BetaHead.forward: softplus(x @ W + b) + 1 -> [B, n_act, 2]
    (or [B, num_policies, n_act, 2] when num_policies > 1)."""
    B, in_size = x.shape
    assert in_size == params.in_size
    pack = params.pack
    two_n = 2 * params.n_act * params.num_policies
    n_lanes = pack * two_n
    k_packed = pack * in_size

    # Packed-row bookkeeping: `pack` batch rows per lane-dense packed row; sublane-aligned
    # tiles; guarantee >= 2 grid steps when there is enough work (megacore / 2 TC split).
    bp_needed = -(-B // pack)
    bp_tile = min(block_rows, _ceil_to(bp_needed, _SUBLANE))
    if bp_needed >= 2 * _SUBLANE and -(-bp_needed // bp_tile) < 2:
        bp_tile = _ceil_to(-(-bp_needed // 2), _SUBLANE)
    bp_total = _ceil_to(bp_needed, bp_tile)
    b_pad = bp_total * pack
    if b_pad != B:
        x = jnp.pad(x, ((0, b_pad - B), (0, 0)))

    # Free row-major repack of activations; explicit compute dtype (bf16 by default).
    x_packed = x.reshape(bp_total, k_packed).astype(params.w_packed.dtype)

    grid = (bp_total // bp_tile,)
    # VMEM budget / grid step: 2*bp_tile*(k_packed*2B + n_lanes*4B) + k_packed*n_lanes*2B
    # ~= 1 MiB at the defaults -- far under even v7x's 32 MiB scoped / 64 MiB physical.
    semantics = pltpu.CORE_PARALLEL if core_parallel else pltpu.PARALLEL

    out_packed = pl.pallas_call(
        beta_head_kernel,
        out_shape=jax.ShapeDtypeStruct((bp_total, n_lanes), out_dtype),
        grid_spec=pl.GridSpec(
            grid=grid,
            in_specs=[
                # Streamed batch tiles (double-buffered by the Pallas pipeline).
                pl.BlockSpec((bp_tile, k_packed), lambda i: (i, 0)),
                # Weight / bias: constant index_map -> fetched once, VMEM-resident;
                # Buffered(1) drops the pointless second pipeline buffer.
                pl.BlockSpec((k_packed, n_lanes), lambda i: (0, 0),
                             pipeline_mode=pl.Buffered(1)),
                pl.BlockSpec((1, n_lanes), lambda i: (0, 0),
                             pipeline_mode=pl.Buffered(1)),
            ],
            out_specs=pl.BlockSpec((bp_tile, n_lanes), lambda i: (i, 0)),
        ),
        compiler_params=pltpu.CompilerParams(
            dimension_semantics=(semantics,),
        ),
    )(x_packed, params.w_packed, params.b_packed)

    out = out_packed.reshape(b_pad, two_n)[:B]  # free row-major unpack + drop padding
    if params.num_policies > 1:
        # Column order matches ReshapeLayer((num_policies, n, 2)): [policy][act][alpha/beta].
        return out.reshape(B, params.num_policies, params.n_act, 2)
    return out.reshape(B, params.n_act, 2)


def init_params(key, in_size, n_act, num_policies=1):
    """Orthogonal init (gain 0.01) like layer_init(..., 'pi'); zero bias."""
    total = 2 * n_act * num_policies
    w = jax.nn.initializers.orthogonal(scale=ORTHOGONAL_INIT_PI_GAIN)(
        key, (in_size, total), jnp.float32
    )
    b = jnp.zeros((1, total), jnp.float32)
    return w, b


if __name__ == "__main__":
    B, in_size, n_act = 8, 32, 8  # small shapes consistent with BetaHead(in_size=32, n=8)

    key = jax.random.PRNGKey(0)
    kx, kw = jax.random.split(key)
    x = jax.random.normal(kx, (B, in_size), jnp.float32)
    w, b = init_params(kw, in_size, n_act)
    params = pack_beta_head_params(w, b, n_act)  # built once, NOT per forward call

    def ref_forward(xx, ww, bb, n, npol=1):
        y = jax.nn.softplus(xx @ ww + bb) + 1.0
        if npol > 1:
            return y.reshape(xx.shape[0], npol, n, 2)
        return y.reshape(xx.shape[0], n, 2)

    out = jax.block_until_ready(beta_head_forward(x, params))
    ref = ref_forward(x, w, b, n_act)
    assert out.shape == (B, n_act, 2)
    assert jnp.allclose(out, ref, atol=1e-2, rtol=1e-2)
    # Beta-distribution parameters must be >= 1 after softplus(.) + 1.
    assert bool(jnp.all(out >= 1.0))

    # Batch padding path (B not a multiple of the pack factor / tile).
    B2 = 12
    x2 = jax.random.normal(jax.random.PRNGKey(1), (B2, in_size), jnp.float32)
    out2 = jax.block_until_ready(beta_head_forward(x2, params))
    assert out2.shape == (B2, n_act, 2)
    assert jnp.allclose(out2, ref_forward(x2, w, b, n_act), atol=1e-2, rtol=1e-2)

    # Multi-tile grid (forced >= 2 grid steps) + bf16-output option.
    B3 = 300
    x3 = jax.random.normal(jax.random.PRNGKey(2), (B3, in_size), jnp.float32)
    out3 = jax.block_until_ready(
        beta_head_forward(x3, params, out_dtype=jnp.bfloat16))
    assert out3.shape == (B3, n_act, 2)
    assert jnp.allclose(out3.astype(jnp.float32), ref_forward(x3, w, b, n_act),
                        atol=2e-2, rtol=2e-2)

    # num_policies > 1: verify the [policy][act][alpha/beta] column ordering.
    npol = 2
    w4, b4 = init_params(jax.random.PRNGKey(3), in_size, n_act, npol)
    params4 = pack_beta_head_params(w4, b4, n_act, npol)
    out4 = jax.block_until_ready(beta_head_forward(x, params4))
    assert out4.shape == (B, npol, n_act, 2)
    assert jnp.allclose(out4, ref_forward(x, w4, b4, n_act, npol), atol=1e-2, rtol=1e-2)

    print("KERNEL_OK")
</pallas_src>

<mosaic_0001>
module attributes {stable_mosaic.version = 11 : i64} {
  func.func @beta_head_kernel(%arg0: i32, %arg1: memref<16x256xbf16, #tpu.memory_space<vmem>>, %arg2: memref<256x128xbf16, #tpu.memory_space<vmem>>, %arg3: memref<1x128xf32, #tpu.memory_space<vmem>>, %arg4: memref<16x128xf32, #tpu.memory_space<vmem>>) attributes {dimension_semantics = [#tpu.dimension_semantics<parallel>], iteration_bounds = array<i64: 1>, scalar_prefetch = 0 : i64, scratch_operands = 0 : i64, tpu.core_type = #tpu.core_type<tc>, window_params = [{transform_indices = @transform_0, window_bounds = array<i64: 16, 256>}, {pipeline_mode = #tpu.pipeline_mode<synchronous>, transform_indices = @transform_1, window_bounds = array<i64: 256, 128>}, {pipeline_mode = #tpu.pipeline_mode<synchronous>, transform_indices = @transform_2, window_bounds = array<i64: 1, 128>}, {transform_indices = @transform_3, window_bounds = array<i64: 16, 128>}]} {
    %c0 = arith.constant 0 : index
    %c0_0 = arith.constant 0 : index
    %0 = vector.load %arg1[%c0, %c0_0] : memref<16x256xbf16, #tpu.memory_space<vmem>>, vector<16x256xbf16>
    %c0_1 = arith.constant 0 : index
    %c0_2 = arith.constant 0 : index
    %1 = vector.load %arg2[%c0_1, %c0_2] : memref<256x128xbf16, #tpu.memory_space<vmem>>, vector<256x128xbf16>
    %cst = arith.constant dense<0.000000e+00> : vector<16x128xf32>
    %2 = tpu.matmul %0, %1, %cst {dimension_numbers = #tpu.dot_dimension_numbers<[1], [0], [0], [1], [0, 0, 1, 1], [], []>} : vector<16x256xbf16>, vector<256x128xbf16>, vector<16x128xf32> -> vector<16x128xf32>
    %c0_3 = arith.constant 0 : index
    %c0_4 = arith.constant 0 : index
    %3 = vector.load %arg3[%c0_3, %c0_4] : memref<1x128xf32, #tpu.memory_space<vmem>>, vector<1x128xf32>
    %4 = vector.broadcast %3 : vector<1x128xf32> to vector<16x128xf32>
    %5 = arith.addf %2, %4 : vector<16x128xf32>
    %cst_5 = arith.constant 0.000000e+00 : f32
    %6 = vector.broadcast %cst_5 : f32 to vector<16x128xf32>
    %7 = arith.maximumf %5, %6 : vector<16x128xf32>
    %8 = math.absf %5 : vector<16x128xf32>
    %cst_6 = arith.constant 0.000000e+00 : f32
    %9 = vector.broadcast %cst_6 : f32 to vector<16x128xf32>
    %10 = arith.subf %9, %8 : vector<16x128xf32>
    %11 = math.exp %10 : vector<16x128xf32>
    %12 = math.log1p %11 : vector<16x128xf32>
    %13 = arith.addf %7, %12 : vector<16x128xf32>
    %cst_7 = arith.constant 1.000000e+00 : f32
    %14 = vector.broadcast %cst_7 : f32 to vector<16x128xf32>
    %15 = arith.addf %13, %14 : vector<16x128xf32>
    %c0_8 = arith.constant 0 : index
    %c0_9 = arith.constant 0 : index
    %16 = vector.load %arg4[%c0_8, %c0_9] : memref<16x128xf32, #tpu.memory_space<vmem>>, vector<16x128xf32>
    tpu.vector_store %arg4[%c0_8, %c0_9], %15 {strides = array<i32>} : memref<16x128xf32, #tpu.memory_space<vmem>>, vector<16x128xf32>,
    return
  }
  func.func @transform_0(%arg0: i32) -> (i32, i32) {
    %c0_i32 = arith.constant 0 : i32
    %c0_i32_0 = arith.constant 0 : i32
    return %arg0, %c0_i32 : i32, i32
  }
  func.func @transform_1(%arg0: i32) -> (i32, i32) {
    %c0_i32 = arith.constant 0 : i32
    %c0_i32_0 = arith.constant 0 : i32
    %c0_i32_1 = arith.constant 0 : i32
    return %c0_i32, %c0_i32_0 : i32, i32
  }
  func.func @transform_2(%arg0: i32) -> (i32, i32) {
    %c0_i32 = arith.constant 0 : i32
    %c0_i32_0 = arith.constant 0 : i32
    %c0_i32_1 = arith.constant 0 : i32
    return %c0_i32, %c0_i32_0 : i32, i32
  }
  func.func @transform_3(%arg0: i32) -> (i32, i32) {
    %c0_i32 = arith.constant 0 : i32
    %c0_i32_0 = arith.constant 0 : i32
    return %arg0, %c0_i32 : i32, i32
  }
}

</mosaic_0001>

<bundles_post_ra>
// kernel: tpu_custom_call.1
= control target key start
LH: loop header
LB: loop body
LE: loop exit
PB: predicated region body
PF: predicated region fallthrough
CT: control target
= control target key end

     0   :  { %8 = vsyncpa [#allocation3], 0  ;;  %s503_s0 = inlined_call_operand.hbm [shape: bf16[16,256], index: 0, kind: input, shape index: {}]   ;;  %s504_s1 = inlined_call_operand.hbm [shape: bf16[256,128], index: 1, kind: input, shape index: {}]   ;;  %s505_s2 = inlined_call_operand.vmem [shape: f32[1,128], index: 2, kind: input, shape index: {}]   ;;  %s506_s3 = inlined_call_operand.hbm [shape: f32[16,128], index: 3, kind: output, shape index: {}]  }
   0x1   :  { %9 = vsyncpa [#allocation6], 0 }
   0x2   :  { %10 = vsyncpa [#allocation4], 0  ;;  %s431_s12 = smov [#allocation2]   ;;  %s359_s16 = scalar_lea.hbm %s503_s0, 256 }
   0x3   :  { %s16_s13 = sshll.u32 %s431_s12, 4  ;;  %p360_p0 = scmp.ne.s32.totalorder %s503_s0, %s359_s16  ;;  %s17_s13 = int_to_ptr.vmem [resolvable:$true] %s16_s13 }
   0x4   :  { %p363_p1 = scmp.lt.u32.totalorder %s359_s16, %s503_s0 }
   0x6   :  { %p365_p2 = pnand %p363_p1, %p360_p0 }
   0x8   :  { %368 = shalt.err (!%p365_p2)
}
   0x9   :  { %s369_s21 = scalar_lea.vmem %s17_s13, 256  ;;  %p374_p4 = scmp.lt.s32.totalorder %s17_s13, %s17_s13 }
   0xa   :  { %p370_p3 = scmp.ne.s32.totalorder %s17_s13, %s369_s21  ;;  %p375_p5 = scmp.lt.s32.totalorder %s369_s21, %s369_s21 }
   0xc   :  { %p376_p6 = por %p375_p5, %p374_p4 }
   0xe   :  { %p377_p7 = pnand %p376_p6, %p370_p3 }
  0x10   :  { %380 = shalt.err (!%p377_p7)
}
  0x11   :  { %s432_s22 = smov 128   ;;  %s433_s23 = smov 8  }
  0x12   :  { %22 = dma.hbm_to_vmem [thread:$0]  %s503_s0, 256, %s17_s13, [#allocation3], %s432_s22, %s432_s22, %s433_s23  }
  0x13   :  { %s434_s26 = smov [#allocation5]   ;;  %s381_s30 = scalar_lea.hbm %s504_s1, 2048 }
  0x14   :  { %s28_s27 = sshll.u32 %s434_s26, 4  ;;  %p382_p8 = scmp.ne.s32.totalorder %s504_s1, %s381_s30  ;;  %s29_s27 = int_to_ptr.vmem [resolvable:$true] %s28_s27 }
  0x15   :  { %p385_p9 = scmp.lt.u32.totalorder %s381_s30, %s504_s1 }
  0x17   :  { %p387_p10 = pnand %p385_p9, %p382_p8 }
  0x19   :  { %390 = shalt.err (!%p387_p10)
}
  0x1a   :  { %s391_s8 = scalar_lea.vmem %s29_s27, 2048  ;;  %p396_p12 = scmp.lt.s32.totalorder %s29_s27, %s29_s27 }
  0x1b   :  { %p392_p11 = scmp.ne.s32.totalorder %s29_s27, %s391_s8  ;;  %p397_p13 = scmp.lt.s32.totalorder %s391_s8, %s391_s8 }
  0x1d   :  { %p398_p0 = por %p397_p13, %p396_p12 }
  0x1f   :  { %p399_p1 = pnand %p398_p0, %p392_p11 }
  0x21   :  { %402 = shalt.err (!%p399_p1)
}
  0x22   :  { %s435_s0 = smov 64   ;;  %s436_s9 = smov 4  }
  0x23   :  { %34 = dma.hbm_to_vmem [thread:$0]  %s504_s1, 2048, %s29_s27, [#allocation6], %s435_s0, %s435_s0, %s436_s9  }
  0x24   :  { %425 = dma.done.wait [#allocation3], 256  }
  0x25   :  { %426 = vsyncadd [#allocation3], 4294967040 }
  0x26   :  { %427 = dma.done.wait [#allocation6], 2048  }
  0x27   :  { %428 = vsyncadd [#allocation6], 4294965248  ;;  %v332_v0 = vld [vmem:[#allocation5 + $0x40] sm:$0xff]   ;;  %v334_v2 = vld [vmem:[#allocation5 + $0x48] sm:$0xff]  }
  0x28   :  { %v333_v1 = vld [vmem:[#allocation5] sm:$0xff]   ;;  %303 = vmatprep.subr.bf16.mxu0 %v332_v0  ;;  %v335_v3 = vld [vmem:[#allocation5 + $0x8] sm:$0xff]   ;;  %v336_v4 = vld [vmem:[#allocation5 + $0x50] sm:$0xff]  }
  0x29   :  { %304 = vmatpush3.bf16.msra.mxu0 %v333_v1  ;;  %v337_v5 = vld [vmem:[#allocation5 + $0x10] sm:$0xff]   ;;  %v338_v6 = vld [vmem:[#allocation5 + $0x58] sm:$0xff]   ;;  %v340_v8 = vld [vmem:[#allocation5 + $0x60] sm:$0xff]  }
  0x2a   :  { %305 = vmatprep.subr.bf16.mxu0 %v334_v2  ;;  %v339_v7 = vld [vmem:[#allocation5 + $0x18] sm:$0xff]   ;;  %v341_v9 = vld [vmem:[#allocation5 + $0x20] sm:$0xff]   ;;  %v342_v10 = vld [vmem:[#allocation5 + $0x68] sm:$0xff]  }
  0x2b   :  { %v350_v11 = vld [vmem:[#allocation2 + $0x4] ss:$8 sps:$4 sm:$0xff]   ;;  %v343_v12 = vld [vmem:[#allocation5 + $0x28] sm:$0xff]   ;;  %v348_v17 = vld [vmem:[#allocation2] ss:$8 sps:$4 sm:$0xff]  }
  0x2c   :  { %223 = vmatprep.mubr.bf16.mxu0 %v350_v11  ;;  %v344_v13 = vld [vmem:[#allocation5 + $0x70] sm:$0xff]   ;;  %v346_v15 = vld [vmem:[#allocation5 + $0x78] sm:$0xff]  }
  0x2d   :  { %306 = vmatpush3.bf16.msra.mxu0 %v335_v3  ;;  %v345_v14 = vld [vmem:[#allocation5 + $0x30] sm:$0xff]   ;;  %v347_v16 = vld [vmem:[#allocation5 + $0x38] sm:$0xff]  }
  0x2e   :  { %307 = vmatprep.subr.bf16.mxu0 %v336_v4  ;;  %v284_v19 = vld [vmem:[%s505_s2] ss:$0 sm:$0xff]  ;;  %s437_s2 = smov [#allocation7]  }
  0x2f   :  { %s271_s13 = sshll.u32 %s437_s2, 4  ;;  %s272_s13 = int_to_ptr.vmem [resolvable:$true] %s271_s13 }
  0x30   :  { %s403_s14 = scalar_lea.vmem %s272_s13, 256  ;;  %p408_p3 = scmp.lt.s32.totalorder %s272_s13, %s272_s13 }
  0x31   :  { %308 = vmatpush3.bf16.msra.mxu0 %v337_v5  ;;  %p404_p2 = scmp.ne.s32.totalorder %s272_s13, %s403_s14  ;;  %p409_p4 = scmp.lt.s32.totalorder %s403_s14, %s403_s14 }
  0x32   :  { %309 = vmatprep.subr.bf16.mxu0 %v338_v6 }
  0x33   :  { %p410_p5 = por %p409_p4, %p408_p3 }
  0x35   :  { %310 = vmatpush3.bf16.msra.mxu0 %v339_v7  ;;  %p411_p6 = pnand %p410_p5, %p404_p2 }
  0x36   :  { %311 = vmatprep.subr.bf16.mxu0 %v340_v8 }
  0x39   :  { %312 = vmatpush3.bf16.msra.mxu0 %v341_v9 }
  0x3a   :  { %313 = vmatprep.subr.bf16.mxu0 %v342_v10 }
  0x3d   :  { %314 = vmatpush3.bf16.msra.mxu0 %v343_v12 }
  0x3e   :  { %315 = vmatprep.subr.bf16.mxu0 %v344_v13 }
  0x41   :  { %316 = vmatpush3.bf16.msra.mxu0 %v345_v14 }
  0x42   :  { %317 = vmatprep.subr.bf16.mxu0 %v346_v15 }
  0x45   :  { %318 = vmatpush3.bf16.msra.mxu0 %v347_v16 }
  0x48   :  { %224 = vmatmul.mubr.bf16.vlgmr.msra.gmra.mrb[0].mxu0 %v348_v17 }
 0x11b   :  { %v319_v18 = vpop.f32.mrb[0].mxu0 }
 0x11c   :  { %v320_v20 = vpop.f32.mrb[1].mxu0 }
 0x11d   :  { %v321_v21 = vadd.f32 %v320_v20, %v319_v18  ;;  %v322_v22 = vpop.f32.mrb[2].mxu0 }
 0x11e   :  { %v323_v23 = vpop.f32.mrb[3].mxu0 }
 0x11f   :  { %v226_v24 = vadd.f32 %v321_v21, %v284_v19  ;;  %v324_v25 = vadd.f32 %v323_v23, %v322_v22 }
 0x121   :  { %v234_v26 = vand.u32 2147483647, %v226_v24  ;;  %v229_v27 = vadd.f32 %v324_v25, %v284_v19  ;;  %v232_v47 = vmax.f32 %v226_v24, 0.0 }
 0x123   :  { %v236_v28 = vsub.f32 0.0, %v234_v26  ;;  %v235_v29 = vand.u32 2147483647, %v229_v27  ;;  %v233_v51 = vmax.f32 %v229_v27, 0.0 }
 0x125   :  { %v238_v30 = vmul.f32 1.442695, %v236_v28  ;;  %v237_v31 = vsub.f32 0.0, %v235_v29 }
 0x127   :  { %351 = vpow2.f32 %v238_v30  ;;  %v240_v32 = vmul.f32 1.442695, %v237_v31 }
 0x129   :  { %353 = vpow2.f32 %v240_v32 }
 0x131   :  { %v352_v33 = vpop.eup %351 }
 0x132   :  { %v242_v34 = vadd.f32 1.0, %v352_v33  ;;  %v245_v37 = vmul.f32 -0.5, %v352_v33  ;;  %v248_v40 = vand.u32 2147483647, %v352_v33 }
 0x133   :  { %v354_v35 = vpop.eup %353 }
 0x134   :  { %355 = vlog2.f32 %v242_v34  ;;  %v251_v36 = vadd.f32 1.0, %v354_v35  ;;  %v254_v38 = vmul.f32 -0.5, %v354_v35  ;;  %v246_v39 = vadd.f32 1.0, %v245_v37 }
 0x135   :  { %v257_v43 = vand.u32 2147483647, %v354_v35  ;;  %vm249_vm0 = vcmp.lt.f32.partialorder %v248_v40, 0.0004427343 }
 0x136   :  { %357 = vlog2.f32 %v251_v36  ;;  %v255_v41 = vadd.f32 1.0, %v254_v38  ;;  %v247_v45 = vmul.f32 %v352_v33, %v246_v39 }
 0x137   :  { %vm258_vm1 = vcmp.lt.f32.partialorder %v257_v43, 0.0004427343 }
 0x138   :  { %v256_v50 = vmul.f32 %v354_v35, %v255_v41 }
 0x13e   :  { %v356_v42 = vpop.eup %355 }
 0x13f   :  { %v244_v44 = vmul.f32 0.6931472, %v356_v42 }
 0x140   :  { %v358_v46 = vpop.eup %357 }
 0x141   :  { %v250_v48 = vsel %vm249_vm0, %v247_v45, %v244_v44  ;;  %v253_v49 = vmul.f32 0.6931472, %v358_v46 }
 0x142   :  { %v260_v52 = vadd.f32 %v250_v48, %v232_v47 }
 0x143   :  { %v259_v53 = vsel %vm258_vm1, %v256_v50, %v253_v49 }
 0x144   :  { %v261_v54 = vadd.f32 %v259_v53, %v233_v51  ;;  %v262_v55 = vadd.f32 1.0, %v260_v52 }
 0x146   :  { %v263_v56 = vadd.f32 1.0, %v261_v54  ;;  %264 = vst [vmem:[#allocation7] sm:$0xff] %v262_v55 }
 0x148   :  { %265 = vst [vmem:[#allocation7 + $0x8] sm:$0xff] %v263_v56 }
 0x149   :  { %414 = shalt.err (!%p411_p6)
}
 0x14a   :  { %s415_s17 = scalar_lea.hbm %s506_s3, 256 }
 0x14b   :  { %p416_p7 = scmp.ne.s32.totalorder %s506_s3, %s415_s17  ;;  %p419_p8 = scmp.lt.u32.totalorder %s415_s17, %s506_s3 }
 0x14d   :  { %p421_p9 = pnand %p419_p8, %p416_p7 }
 0x14f   :  { %424 = shalt.err (!%p421_p9)
}
 0x150   :  { %277 = dma.vmem_to_hbm [thread:$0]  %s272_s13, 256, %s506_s3, [#allocation4], %s432_s22, %s432_s22, %s433_s23  }
 0x151   :  { %429 = dma.done.wait [#allocation4], 256  }
 0x152   :  { %430 = vsyncadd [#allocation4], 4294967040 }
 0x153   :  { %281 = vsyncpa [#allocation3], 1 }
 0x154   :  { %282 = vsyncpa [#allocation6], 1 }
 0x155   :  { %283 = vsyncpa [#allocation4], 1 }

</bundles_post_ra>
